<compile_context>
chip_gen: v7x
topology: tpu7x:2x2x1
jax: 0.10.0
libtpu: 0.0.40
codegen_flags: <defaults>
</compile_context>

<pallas_src>
import functools

import jax
import jax.numpy as jnp
from jax import lax
from jax.experimental import pallas as pl
from jax.experimental.pallas import tpu as pltpu

VMEM = pltpu.MemorySpace.VMEM
LANES = 128


# ------------------------------ fused kernel --------------------------------

def hybrid_kernel(xp_ref, edge_ref, src_ref, tgt_ref, w_ref, b_ref, o_ref,
                  *, H, Ep):
    """Whole HybridBlock forward; all intermediates stay in vregs/VMEM."""
    Npad = xp_ref.shape[0]
    Etot = src_ref.shape[0]
    L = xp_ref.shape[1]                      # 128

    xp = xp_ref[...]                         # [Npad, 128]  = [x | x | x | 0]
    edge = edge_ref[...]                     # [Etot, 128]

    # Static slices of the packed weight / bias slabs (zero runtime cost).
    Wf1 = w_ref[0 * L:1 * L, :]
    Wf2 = w_ref[1 * L:2 * L, :]
    Wrel = w_ref[2 * L:3 * L, :]
    Wroot = w_ref[3 * L:4 * L, :]
    Wcat = w_ref[4 * L:5 * L, :]
    Wg1 = w_ref[5 * L:6 * L, :]
    Wg2 = w_ref[6 * L:7 * L, :]
    bf1 = b_ref[0:1, :]
    bf2 = b_ref[1:2, :]
    brel = b_ref[2:3, :]
    bcat = b_ref[3:4, :]
    bg1 = b_ref[4:5, :]
    bg2 = b_ref[5:6, :]
    zscale = b_ref[6:7, :]                   # (1 + eps) broadcast row

    # --- packed feature MLPs over all edge rows (GINE/pad rows masked below)
    t = jnp.maximum(jnp.dot(edge, Wf1, preferred_element_type=jnp.float32) + bf1, 0.0)
    f12 = jnp.dot(t, Wf2, preferred_element_type=jnp.float32) + bf2   # cols 0:2H valid

    row_idx = lax.broadcasted_iota(jnp.int32, (Etot, 1), 0)
    is_pos = row_idx < Ep                                              # [Etot, 1]
    lane = lax.broadcasted_iota(jnp.int32, (1, L), 1)
    gine_lane = jnp.logical_and(lane >= 2 * H, lane < 3 * H)           # cols 2H:3H

    f12 = jnp.where(is_pos, f12, 0.0)

    # --- single one-hot gather of the packed node features
    gmask = (src_ref[...] ==
             lax.broadcasted_iota(jnp.int32, (Etot, Npad), 1)).astype(jnp.float32)
    xj = jnp.dot(gmask, xp, preferred_element_type=jnp.float32)        # [Etot, 128]

    # --- merged message matrix: cols 0:2H = EdgeGraphConv, cols 2H:3H = GINE
    gine_msg = jnp.where(jnp.logical_and(jnp.logical_not(is_pos), gine_lane),
                         xj + edge, 0.0)
    msg = f12 * xj + gine_msg                                          # [Etot, 128]

    # --- single one-hot scatter-add
    smask = (lax.broadcasted_iota(jnp.int32, (Npad, Etot), 0) ==
             tgt_ref[...]).astype(jnp.float32)
    agg = jnp.dot(smask, msg, preferred_element_type=jnp.float32)      # [Npad, 128]

    # --- EdgeGraphConv pair (packed) + linear_cat
    h12 = jnp.maximum(jnp.dot(agg, Wrel, preferred_element_type=jnp.float32)
                      + jnp.dot(xp, Wroot, preferred_element_type=jnp.float32)
                      + brel, 0.0)                                     # cols 0:2H = [h1|h2]
    h = jnp.maximum(jnp.dot(h12, Wcat, preferred_element_type=jnp.float32) + bcat, 0.0)

    # --- GINEConv (BatchNorm folded into Wg1/bg1)
    z = zscale * xp + agg                                              # cols 2H:3H = (1+eps)x + agg3
    hh = jnp.maximum(jnp.dot(z, Wg1, preferred_element_type=jnp.float32) + bg1, 0.0)
    h3 = jnp.dot(hh, Wg2, preferred_element_type=jnp.float32) + bg2

    o_ref[...] = h + h3                                                # lane-dense [Npad, 128] store


# ----------------------------- wrapper / packing -----------------------------

def _block_diag2(a, b):
    m1, n1 = a.shape
    m2, n2 = b.shape
    out = jnp.zeros((m1 + m2, n1 + n2), jnp.float32)
    return out.at[:m1, :n1].set(a).at[m1:, n1:].set(b)


def _place(block, r0=0, c0=0, rows=LANES, cols=LANES):
    z = jnp.zeros((rows, cols), jnp.float32)
    return z.at[r0:r0 + block.shape[0], c0:c0 + block.shape[1]].set(block)


def hybrid_block_forward(params, x, feature1, feature2,
                         pos_edge_index, edge_index, edge_attr):
    N, H = x.shape
    Ep = feature1.shape[0]
    E = edge_attr.shape[0]
    F1 = feature1.shape[1]
    F12 = F1 + feature2.shape[1]
    assert 3 * H <= LANES and F12 <= LANES

    Etot = ((Ep + E + 7) // 8) * 8
    Npad = ((N + 7) // 8) * 8

    # ---- fold eval-mode BatchNorm into the GINE MLP first layer (exact) ----
    s = params['gamma'] * lax.rsqrt(params['run_var'] + 1e-5)
    wg1_f = params['wg1'] * s
    bg1_f = (params['bg1'] - params['run_mean']) * s + params['beta']

    # ---- packed weight slab [7*128, 128] ----
    w_slab = jnp.concatenate([
        _place(_block_diag2(params['w11'], params['w21'])),                     # Wf1
        _place(_block_diag2(params['w12'], params['w22'])),                     # Wf2
        _place(_block_diag2(params['wrel1'], params['wrel2'])),                 # Wrel
        _place(jnp.concatenate([params['wroot1'], params['wroot2']], axis=1)),  # Wroot
        _place(jnp.concatenate([params['wcat_a'], params['wcat_b']], axis=0)),  # Wcat
        _place(wg1_f, r0=2 * H),                                                # Wg1 (reads z cols 2H:3H)
        _place(params['wg2']),                                                  # Wg2
    ], axis=0)

    # ---- packed bias / scalar slab [8, 128] ----
    def row(v):
        return _place(v, rows=1, cols=LANES)
    b_slab = jnp.concatenate([
        row(jnp.concatenate([params['b11'], params['b21']], axis=1)),
        row(jnp.concatenate([params['b12'], params['b22']], axis=1)),
        row(jnp.concatenate([params['brel1'], params['brel2']], axis=1)),
        row(params['bcat']),
        row(bg1_f),
        row(params['bg2']),
        jnp.full((1, LANES), 1.0 + params['eps'][0], jnp.float32),
        jnp.zeros((1, LANES), jnp.float32),
    ], axis=0)

    # ---- node features, lane-dense: [x | x | x | 0] ----
    xp = jnp.zeros((Npad, LANES), jnp.float32)
    xp = xp.at[:N, 0:H].set(x).at[:N, H:2 * H].set(x).at[:N, 2 * H:3 * H].set(x)

    # ---- edge feature slab: pos rows hold [feature1|feature2], GINE rows hold edge_attr
    edge_slab = jnp.zeros((Etot, LANES), jnp.float32)
    edge_slab = edge_slab.at[:Ep, :F1].set(feature1)
    edge_slab = edge_slab.at[:Ep, F1:F12].set(feature2)
    edge_slab = edge_slab.at[Ep:Ep + E, 2 * H:3 * H].set(edge_attr)

    # ---- combined edge indices (pad rows use -1 -> no match in one-hot) ----
    src = jnp.full((Etot,), -1, jnp.int32)
    src = src.at[:Ep].set(pos_edge_index[0].astype(jnp.int32))
    src = src.at[Ep:Ep + E].set(edge_index[0].astype(jnp.int32))
    tgt = jnp.full((Etot,), -1, jnp.int32)
    tgt = tgt.at[:Ep].set(pos_edge_index[1].astype(jnp.int32))
    tgt = tgt.at[Ep:Ep + E].set(edge_index[1].astype(jnp.int32))
    src_col = src.reshape(Etot, 1)
    tgt_row = tgt.reshape(1, Etot)

    kernel = functools.partial(hybrid_kernel, H=H, Ep=Ep)
    out = pl.pallas_call(
        kernel,
        out_shape=jax.ShapeDtypeStruct((Npad, LANES), jnp.float32),
        in_specs=[pl.BlockSpec(memory_space=VMEM)] * 6,
        out_specs=pl.BlockSpec(memory_space=VMEM),
    )(xp, edge_slab, src_col, tgt_row, w_slab, b_slab)
    return out[:N, :H]


# ------------------------------ pure-JAX reference ---------------------------

def reference_forward(params, x, feature1, feature2,
                      pos_edge_index, edge_index, edge_attr):
    N = x.shape[0]

    def mlp2_ref(z, w1, b1, w2, b2):
        return jnp.maximum(z @ w1 + b1, 0.0) @ w2 + b2

    def scatter_add(tgt, msg, n):
        return jnp.zeros((n, msg.shape[1]), msg.dtype).at[tgt].add(msg)

    f1 = mlp2_ref(feature1, params['w11'], params['b11'], params['w12'], params['b12'])
    f2 = mlp2_ref(feature2, params['w21'], params['b21'], params['w22'], params['b22'])
    src_p, tgt_p = pos_edge_index
    agg1 = scatter_add(tgt_p, f1 * x[src_p], N)
    h1 = jnp.maximum(agg1 @ params['wrel1'] + params['brel1'] + x @ params['wroot1'], 0.0)
    agg2 = scatter_add(tgt_p, f2 * x[src_p], N)
    h2 = jnp.maximum(agg2 @ params['wrel2'] + params['brel2'] + x @ params['wroot2'], 0.0)

    wcat = jnp.concatenate([params['wcat_a'], params['wcat_b']], axis=0)
    h = jnp.maximum(jnp.concatenate([h1, h2], axis=1) @ wcat + params['bcat'], 0.0)

    src, tgt = edge_index
    agg3 = scatter_add(tgt, x[src] + edge_attr, N)
    z = (1.0 + params['eps'][0]) * x + agg3
    hh = z @ params['wg1'] + params['bg1']
    hh = (hh - params['run_mean']) * lax.rsqrt(params['run_var'] + 1e-5) \
         * params['gamma'] + params['beta']
    hh = jnp.maximum(hh, 0.0)
    h3 = hh @ params['wg2'] + params['bg2']
    return h + h3


# ---------------------------------- main -------------------------------------

if __name__ == "__main__":
    key = jax.random.PRNGKey(0)
    N, Ep, E = 16, 24, 24
    hidden, middle = 32, 48
    num_radial, num_spherical = 4, 3
    F1 = num_radial * num_spherical ** 2     # 36
    F2 = num_radial * num_spherical          # 12
    keys = jax.random.split(key, 24)

    def init_w(k, shape):
        return (jax.random.normal(k, shape, jnp.float32) / jnp.sqrt(shape[0])).astype(jnp.float32)

    params = {
        # lin_feat1: MLP([F1, middle, hidden])
        'w11': init_w(keys[0], (F1, middle)),     'b11': jnp.zeros((1, middle), jnp.float32),
        'w12': init_w(keys[1], (middle, hidden)), 'b12': jnp.zeros((1, hidden), jnp.float32),
        # lin_feat2: MLP([F2, middle, hidden])
        'w21': init_w(keys[2], (F2, middle)),     'b21': jnp.zeros((1, middle), jnp.float32),
        'w22': init_w(keys[3], (middle, hidden)), 'b22': jnp.zeros((1, hidden), jnp.float32),
        # conv1 / conv2: EdgeGraphConv(hidden, hidden)
        'wrel1': init_w(keys[4], (hidden, hidden)), 'brel1': 0.01 * jnp.ones((1, hidden), jnp.float32),
        'wroot1': init_w(keys[5], (hidden, hidden)),
        'wrel2': init_w(keys[6], (hidden, hidden)), 'brel2': 0.01 * jnp.ones((1, hidden), jnp.float32),
        'wroot2': init_w(keys[7], (hidden, hidden)),
        # conv3: GINEConv(hidden), norm='batch' (eval-mode running stats)
        'eps': jnp.array([0.25], jnp.float32),
        'wg1': init_w(keys[8], (hidden, hidden)), 'bg1': jnp.zeros((1, hidden), jnp.float32),
        'run_mean': 0.1 * jax.random.normal(keys[18], (1, hidden), jnp.float32),
        'run_var': 0.5 + jax.random.uniform(keys[19], (1, hidden), jnp.float32),
        'gamma': jnp.ones((1, hidden), jnp.float32), 'beta': jnp.zeros((1, hidden), jnp.float32),
        'wg2': init_w(keys[9], (hidden, hidden)), 'bg2': jnp.zeros((1, hidden), jnp.float32),
        # linear_cat: Linear(2*hidden, hidden), stored row-split
        'wcat_a': init_w(keys[10], (hidden, hidden)),
        'wcat_b': init_w(keys[11], (hidden, hidden)),
        'bcat': jnp.zeros((1, hidden), jnp.float32),
    }

    x = jax.random.normal(keys[12], (N, hidden), jnp.float32)
    feature1 = jax.random.normal(keys[13], (Ep, F1), jnp.float32)
    feature2 = jax.random.normal(keys[14], (Ep, F2), jnp.float32)
    edge_attr = jax.random.normal(keys[15], (E, hidden), jnp.float32)
    pos_edge_index = jax.random.randint(keys[16], (2, Ep), 0, N, jnp.int32)
    edge_index = jax.random.randint(keys[17], (2, E), 0, N, jnp.int32)

    out = jax.block_until_ready(
        hybrid_block_forward(params, x, feature1, feature2,
                             pos_edge_index, edge_index, edge_attr))
    ref = reference_forward(params, x, feature1, feature2,
                            pos_edge_index, edge_index, edge_attr)

    assert out.shape == (N, hidden), out.shape
    assert jnp.allclose(out, ref, atol=1e-4, rtol=1e-4), float(jnp.max(jnp.abs(out - ref)))
    print("KERNEL_OK")
</pallas_src>

<mosaic_0001>
module attributes {stable_mosaic.version = 11 : i64} {
  func.func @hybrid_kernel(%arg0: memref<16x128xf32, #tpu.memory_space<vmem>>, %arg1: memref<48x128xf32, #tpu.memory_space<vmem>>, %arg2: memref<48x1xi32, #tpu.memory_space<vmem>>, %arg3: memref<1x48xi32, #tpu.memory_space<vmem>>, %arg4: memref<896x128xf32, #tpu.memory_space<vmem>>, %arg5: memref<8x128xf32, #tpu.memory_space<vmem>>, %arg6: memref<16x128xf32, #tpu.memory_space<vmem>>) attributes {dimension_semantics = [], scalar_prefetch = 0 : i64, scratch_operands = 0 : i64, tpu.core_type = #tpu.core_type<tc>} {
    %c0 = arith.constant 0 : index
    %c0_0 = arith.constant 0 : index
    %0 = vector.load %arg0[%c0, %c0_0] : memref<16x128xf32, #tpu.memory_space<vmem>>, vector<16x128xf32>
    %c0_1 = arith.constant 0 : index
    %c0_2 = arith.constant 0 : index
    %1 = vector.load %arg1[%c0_1, %c0_2] : memref<48x128xf32, #tpu.memory_space<vmem>>, vector<48x128xf32>
    %c0_3 = arith.constant 0 : index
    %c0_4 = arith.constant 0 : index
    %2 = vector.load %arg4[%c0_3, %c0_4] : memref<896x128xf32, #tpu.memory_space<vmem>>, vector<128x128xf32>
    %c128 = arith.constant 128 : index
    %c0_5 = arith.constant 0 : index
    %3 = vector.load %arg4[%c128, %c0_5] : memref<896x128xf32, #tpu.memory_space<vmem>>, vector<128x128xf32>
    %c256 = arith.constant 256 : index
    %c0_6 = arith.constant 0 : index
    %4 = vector.load %arg4[%c256, %c0_6] : memref<896x128xf32, #tpu.memory_space<vmem>>, vector<128x128xf32>
    %c384 = arith.constant 384 : index
    %c0_7 = arith.constant 0 : index
    %5 = vector.load %arg4[%c384, %c0_7] : memref<896x128xf32, #tpu.memory_space<vmem>>, vector<128x128xf32>
    %c512 = arith.constant 512 : index
    %c0_8 = arith.constant 0 : index
    %6 = vector.load %arg4[%c512, %c0_8] : memref<896x128xf32, #tpu.memory_space<vmem>>, vector<128x128xf32>
    %c640 = arith.constant 640 : index
    %c0_9 = arith.constant 0 : index
    %7 = vector.load %arg4[%c640, %c0_9] : memref<896x128xf32, #tpu.memory_space<vmem>>, vector<128x128xf32>
    %c768 = arith.constant 768 : index
    %c0_10 = arith.constant 0 : index
    %8 = vector.load %arg4[%c768, %c0_10] : memref<896x128xf32, #tpu.memory_space<vmem>>, vector<128x128xf32>
    %c0_11 = arith.constant 0 : index
    %c0_12 = arith.constant 0 : index
    %9 = vector.load %arg5[%c0_11, %c0_12] : memref<8x128xf32, #tpu.memory_space<vmem>>, vector<1x128xf32>
    %c1 = arith.constant 1 : index
    %c0_13 = arith.constant 0 : index
    %10 = vector.load %arg5[%c1, %c0_13] : memref<8x128xf32, #tpu.memory_space<vmem>>, vector<1x128xf32>
    %c2 = arith.constant 2 : index
    %c0_14 = arith.constant 0 : index
    %11 = vector.load %arg5[%c2, %c0_14] : memref<8x128xf32, #tpu.memory_space<vmem>>, vector<1x128xf32>
    %c3 = arith.constant 3 : index
    %c0_15 = arith.constant 0 : index
    %12 = vector.load %arg5[%c3, %c0_15] : memref<8x128xf32, #tpu.memory_space<vmem>>, vector<1x128xf32>
    %c4 = arith.constant 4 : index
    %c0_16 = arith.constant 0 : index
    %13 = vector.load %arg5[%c4, %c0_16] : memref<8x128xf32, #tpu.memory_space<vmem>>, vector<1x128xf32>
    %c5 = arith.constant 5 : index
    %c0_17 = arith.constant 0 : index
    %14 = vector.load %arg5[%c5, %c0_17] : memref<8x128xf32, #tpu.memory_space<vmem>>, vector<1x128xf32>
    %c6 = arith.constant 6 : index
    %c0_18 = arith.constant 0 : index
    %15 = vector.load %arg5[%c6, %c0_18] : memref<8x128xf32, #tpu.memory_space<vmem>>, vector<1x128xf32>
    %cst = arith.constant dense<0.000000e+00> : vector<48x128xf32>
    %16 = tpu.matmul %1, %2, %cst {dimension_numbers = #tpu.dot_dimension_numbers<[1], [0], [0], [1], [0, 0, 1, 1], [], []>} : vector<48x128xf32>, vector<128x128xf32>, vector<48x128xf32> -> vector<48x128xf32>
    %17 = vector.broadcast %9 : vector<1x128xf32> to vector<48x128xf32>
    %18 = arith.addf %16, %17 : vector<48x128xf32>
    %cst_19 = arith.constant 0.000000e+00 : f32
    %19 = vector.broadcast %cst_19 : f32 to vector<48x128xf32>
    %20 = arith.maximumf %18, %19 : vector<48x128xf32>
    %cst_20 = arith.constant dense<0.000000e+00> : vector<48x128xf32>
    %21 = tpu.matmul %20, %3, %cst_20 {dimension_numbers = #tpu.dot_dimension_numbers<[1], [0], [0], [1], [0, 0, 1, 1], [], []>} : vector<48x128xf32>, vector<128x128xf32>, vector<48x128xf32> -> vector<48x128xf32>
    %22 = vector.broadcast %10 : vector<1x128xf32> to vector<48x128xf32>
    %23 = arith.addf %21, %22 : vector<48x128xf32>
    %24 = tpu.iota {dimensions = array<i32: 0>} : vector<48x1xi32>
    %c24_i32 = arith.constant 24 : i32
    %25 = vector.broadcast %c24_i32 : i32 to vector<48x1xi32>
    %26 = arith.cmpi slt, %24, %25 : vector<48x1xi32>
    %27 = tpu.iota {dimensions = array<i32: 1>} : vector<1x128xi32>
    %c64_i32 = arith.constant 64 : i32
    %28 = vector.broadcast %c64_i32 : i32 to vector<1x128xi32>
    %29 = arith.cmpi sge, %27, %28 : vector<1x128xi32>
    %c96_i32 = arith.constant 96 : i32
    %30 = vector.broadcast %c96_i32 : i32 to vector<1x128xi32>
    %31 = arith.cmpi slt, %27, %30 : vector<1x128xi32>
    %32 = arith.andi %29, %31 : vector<1x128xi1>
    %cst_21 = arith.constant 0.000000e+00 : f32
    %33 = vector.shape_cast %26 : vector<48x1xi1> to vector<48x1xi1>
    %34 = vector.broadcast %33 : vector<48x1xi1> to vector<48x128xi1>
    %35 = vector.broadcast %cst_21 : f32 to vector<48x128xf32>
    %36 = arith.select %34, %23, %35 : vector<48x128xi1>, vector<48x128xf32>
    %c0_22 = arith.constant 0 : index
    %c0_23 = arith.constant 0 : index
    %37 = vector.load %arg2[%c0_22, %c0_23] : memref<48x1xi32, #tpu.memory_space<vmem>>, vector<48x1xi32>
    %38 = tpu.iota {dimensions = array<i32: 1>} : vector<48x16xi32>
    %39 = vector.broadcast %37 : vector<48x1xi32> to vector<48x16xi32>
    %40 = arith.cmpi eq, %39, %38 : vector<48x16xi32>
    %41 = arith.extui %40 : vector<48x16xi1> to vector<48x16xi32>
    %42 = arith.sitofp %41 : vector<48x16xi32> to vector<48x16xf32>
    %cst_24 = arith.constant dense<0.000000e+00> : vector<48x128xf32>
    %43 = tpu.matmul %42, %0, %cst_24 {dimension_numbers = #tpu.dot_dimension_numbers<[1], [0], [0], [1], [0, 0, 1, 1], [], []>} : vector<48x16xf32>, vector<16x128xf32>, vector<48x128xf32> -> vector<48x128xf32>
    %cst_25 = arith.constant dense<true> : vector<48x1xi1>
    %44 = arith.xori %26, %cst_25 : vector<48x1xi1>
    %45 = vector.broadcast %44 : vector<48x1xi1> to vector<48x128xi1>
    %46 = vector.broadcast %32 : vector<1x128xi1> to vector<48x128xi1>
    %47 = arith.andi %45, %46 : vector<48x128xi1>
    %48 = arith.addf %43, %1 : vector<48x128xf32>
    %cst_26 = arith.constant 0.000000e+00 : f32
    %49 = vector.broadcast %cst_26 : f32 to vector<48x128xf32>
    %50 = arith.select %47, %48, %49 : vector<48x128xi1>, vector<48x128xf32>
    %51 = arith.mulf %36, %43 : vector<48x128xf32>
    %52 = arith.addf %51, %50 : vector<48x128xf32>
    %53 = tpu.iota {dimensions = array<i32: 0>} : vector<16x48xi32>
    %c0_27 = arith.constant 0 : index
    %c0_28 = arith.constant 0 : index
    %54 = vector.load %arg3[%c0_27, %c0_28] : memref<1x48xi32, #tpu.memory_space<vmem>>, vector<1x48xi32>
    %55 = vector.broadcast %54 : vector<1x48xi32> to vector<16x48xi32>
    %56 = arith.cmpi eq, %53, %55 : vector<16x48xi32>
    %57 = arith.extui %56 : vector<16x48xi1> to vector<16x48xi32>
    %58 = arith.sitofp %57 : vector<16x48xi32> to vector<16x48xf32>
    %cst_29 = arith.constant dense<0.000000e+00> : vector<16x128xf32>
    %59 = tpu.matmul %58, %52, %cst_29 {dimension_numbers = #tpu.dot_dimension_numbers<[1], [0], [0], [1], [0, 0, 1, 1], [], []>} : vector<16x48xf32>, vector<48x128xf32>, vector<16x128xf32> -> vector<16x128xf32>
    %cst_30 = arith.constant dense<0.000000e+00> : vector<16x128xf32>
    %60 = tpu.matmul %59, %4, %cst_30 {dimension_numbers = #tpu.dot_dimension_numbers<[1], [0], [0], [1], [0, 0, 1, 1], [], []>} : vector<16x128xf32>, vector<128x128xf32>, vector<16x128xf32> -> vector<16x128xf32>
    %cst_31 = arith.constant dense<0.000000e+00> : vector<16x128xf32>
    %61 = tpu.matmul %0, %5, %cst_31 {dimension_numbers = #tpu.dot_dimension_numbers<[1], [0], [0], [1], [0, 0, 1, 1], [], []>} : vector<16x128xf32>, vector<128x128xf32>, vector<16x128xf32> -> vector<16x128xf32>
    %62 = arith.addf %60, %61 : vector<16x128xf32>
    %63 = vector.broadcast %11 : vector<1x128xf32> to vector<16x128xf32>
    %64 = arith.addf %62, %63 : vector<16x128xf32>
    %cst_32 = arith.constant 0.000000e+00 : f32
    %65 = vector.broadcast %cst_32 : f32 to vector<16x128xf32>
    %66 = arith.maximumf %64, %65 : vector<16x128xf32>
    %cst_33 = arith.constant dense<0.000000e+00> : vector<16x128xf32>
    %67 = tpu.matmul %66, %6, %cst_33 {dimension_numbers = #tpu.dot_dimension_numbers<[1], [0], [0], [1], [0, 0, 1, 1], [], []>} : vector<16x128xf32>, vector<128x128xf32>, vector<16x128xf32> -> vector<16x128xf32>
    %68 = vector.broadcast %12 : vector<1x128xf32> to vector<16x128xf32>
    %69 = arith.addf %67, %68 : vector<16x128xf32>
    %cst_34 = arith.constant 0.000000e+00 : f32
    %70 = vector.broadcast %cst_34 : f32 to vector<16x128xf32>
    %71 = arith.maximumf %69, %70 : vector<16x128xf32>
    %72 = vector.broadcast %15 : vector<1x128xf32> to vector<16x128xf32>
    %73 = arith.mulf %72, %0 : vector<16x128xf32>
    %74 = arith.addf %73, %59 : vector<16x128xf32>
    %cst_35 = arith.constant dense<0.000000e+00> : vector<16x128xf32>
    %75 = tpu.matmul %74, %7, %cst_35 {dimension_numbers = #tpu.dot_dimension_numbers<[1], [0], [0], [1], [0, 0, 1, 1], [], []>} : vector<16x128xf32>, vector<128x128xf32>, vector<16x128xf32> -> vector<16x128xf32>
    %76 = vector.broadcast %13 : vector<1x128xf32> to vector<16x128xf32>
    %77 = arith.addf %75, %76 : vector<16x128xf32>
    %cst_36 = arith.constant 0.000000e+00 : f32
    %78 = vector.broadcast %cst_36 : f32 to vector<16x128xf32>
    %79 = arith.maximumf %77, %78 : vector<16x128xf32>
    %cst_37 = arith.constant dense<0.000000e+00> : vector<16x128xf32>
    %80 = tpu.matmul %79, %8, %cst_37 {dimension_numbers = #tpu.dot_dimension_numbers<[1], [0], [0], [1], [0, 0, 1, 1], [], []>} : vector<16x128xf32>, vector<128x128xf32>, vector<16x128xf32> -> vector<16x128xf32>
    %81 = vector.broadcast %14 : vector<1x128xf32> to vector<16x128xf32>
    %82 = arith.addf %80, %81 : vector<16x128xf32>
    %83 = arith.addf %71, %82 : vector<16x128xf32>
    %c0_38 = arith.constant 0 : index
    %c0_39 = arith.constant 0 : index
    %84 = vector.load %arg6[%c0_38, %c0_39] : memref<16x128xf32, #tpu.memory_space<vmem>>, vector<16x128xf32>
    tpu.vector_store %arg6[%c0_38, %c0_39], %83 {strides = array<i32>} : memref<16x128xf32, #tpu.memory_space<vmem>>, vector<16x128xf32>,
    return
  }
}

</mosaic_0001>

<bundles_post_ra>
// kernel: tpu_custom_call.1
= control target key start
LH: loop header
LB: loop body
LE: loop exit
PB: predicated region body
PF: predicated region fallthrough
CT: control target
= control target key end

     0   :  { %11 = vsyncpa [#allocation3], 0  ;;  %s2148_s0 = inlined_call_operand.hbm [shape: f32[16,128], index: 0, kind: input, shape index: {}]   ;;  %s2149_s1 = inlined_call_operand.vmem [shape: f32[48,128], index: 1, kind: input, shape index: {}]   ;;  %s2150_s2 = inlined_call_operand.vmem [shape: s32[48,1], index: 2, kind: input, shape index: {}]   ;;  %s2151_s3 = inlined_call_operand.vmem [shape: s32[1,48], index: 3, kind: input, shape index: {}]   ;;  %s2152_s4 = inlined_call_operand.hbm [shape: f32[896,128], index: 4, kind: input, shape index: {}]   ;;  %s2153_s5 = inlined_call_operand.vmem [shape: f32[8,128], index: 5, kind: input, shape index: {}]   ;;  %s2154_s6 = inlined_call_operand.hbm [shape: f32[16,128], index: 6, kind: output, shape index: {}]  }
   0x1   :  { %12 = vsyncpa [#allocation6], 0 }
   0x2   :  { %13 = vsyncpa [#allocation4], 0  ;;  %s1929_s21 = smov [#allocation2]   ;;  %s1857_s25 = scalar_lea.hbm %s2148_s0, 256 }
   0x3   :  { %s19_s22 = sshll.u32 %s1929_s21, 4  ;;  %p1858_p0 = scmp.ne.s32.totalorder %s2148_s0, %s1857_s25  ;;  %s20_s22 = int_to_ptr.vmem [resolvable:$true] %s19_s22 }
   0x4   :  { %p1861_p1 = scmp.lt.u32.totalorder %s1857_s25, %s2148_s0 }
   0x6   :  { %p1863_p2 = pnand %p1861_p1, %p1858_p0 }
   0x8   :  { %1866 = shalt.err (!%p1863_p2)
}
   0x9   :  { %s1867_s30 = scalar_lea.vmem %s20_s22, 256  ;;  %p1872_p4 = scmp.lt.s32.totalorder %s20_s22, %s20_s22 }
   0xa   :  { %p1868_p3 = scmp.ne.s32.totalorder %s20_s22, %s1867_s30  ;;  %p1873_p5 = scmp.lt.s32.totalorder %s1867_s30, %s1867_s30 }
   0xc   :  { %p1874_p6 = por %p1873_p5, %p1872_p4 }
   0xe   :  { %p1875_p7 = pnand %p1874_p6, %p1868_p3 }
  0x10   :  { %1878 = shalt.err (!%p1875_p7)
}
  0x11   :  { %s1930_s7 = smov 128   ;;  %s1931_s8 = smov 8  }
  0x12   :  { %25 = dma.hbm_to_vmem [thread:$0]  %s2148_s0, 256, %s20_s22, [#allocation3], %s1930_s7, %s1930_s7, %s1931_s8  }
  0x13   :  { %s1932_s11 = smov [#allocation5]   ;;  %s1879_s15 = scalar_lea.hbm %s2152_s4, 14336 }
  0x14   :  { %s37_s12 = sshll.u32 %s1932_s11, 4  ;;  %p1880_p8 = scmp.ne.s32.totalorder %s2152_s4, %s1879_s15  ;;  %s38_s12 = int_to_ptr.vmem [resolvable:$true] %s37_s12 }
  0x15   :  { %p1883_p9 = scmp.lt.u32.totalorder %s1879_s15, %s2152_s4 }
  0x17   :  { %p1885_p10 = pnand %p1883_p9, %p1880_p8 }
  0x19   :  { %1888 = shalt.err (!%p1885_p10)
}
  0x1a   :  { %s1889_s20 = scalar_lea.vmem %s38_s12, 14336  ;;  %p1894_p12 = scmp.lt.s32.totalorder %s38_s12, %s38_s12 }
  0x1b   :  { %p1890_p11 = scmp.ne.s32.totalorder %s38_s12, %s1889_s20  ;;  %p1895_p13 = scmp.lt.s32.totalorder %s1889_s20, %s1889_s20 }
  0x1d   :  { %p1896_p0 = por %p1895_p13, %p1894_p12 }
  0x1f   :  { %p1897_p1 = pnand %p1896_p0, %p1890_p11 }
  0x21   :  { %1900 = shalt.err (!%p1897_p1)
}
  0x22   :  { %43 = dma.hbm_to_vmem [thread:$0]  %s2152_s4, 14336, %s38_s12, [#allocation6], %s1930_s7, %s1930_s7, %s1931_s8  }
  0x23   :  { %1923 = dma.done.wait [#allocation3], 256  }
  0x24   :  { %1924 = vsyncadd [#allocation3], 4294967040 }
  0x25   :  { %1925 = dma.done.wait [#allocation6], 14336  }
  0x26   :  { %1926 = vsyncadd [#allocation6], 4294952960  ;;  %v1933_v0 = vmov 0   ;;  %v60_v1 = vld [vmem:[#allocation5] sm:$0xff]  ;;  %v61_v2 = vld [vmem:[#allocation5 + $0x8] sm:$0xff]  ;;  %vm461_vm1 = vcmask 130048  }
  0x27   :  { %1855 = vset.pattern.permute.xlu0 %v1933_v0  ;;  %1856 = vset.pattern.permute.xlu1 %v1933_v0  ;;  %v62_v3 = vld [vmem:[#allocation5 + $0x10] sm:$0xff]  ;;  %v1606_v4 = vpack.c.bf16 %v61_v2, %v60_v1  ;;  %v63_v5 = vld [vmem:[#allocation5 + $0x18] sm:$0xff]  ;;  %v64_v7 = vld [vmem:[#allocation5 + $0x20] sm:$0xff]  ;;  %vm636_vm8 = vcmask 392192   ;;  %s1935_s12 = smov [#allocation7]  }
  0x28   :  { %v1610_v6 = vpack.c.bf16 %v63_v5, %v62_v3  ;;  %v65_v8 = vld [vmem:[#allocation5 + $0x28] sm:$0xff]  ;;  %v54_v10 = vld [vmem:[%s2149_s1] sm:$0xff]  ;;  %v67_v12 = vld [vmem:[#allocation5 + $0x38] sm:$0xff] }
  0x29   :  { %1607 = vmatprep.subr.bf16.mxu0 %v1606_v4  ;;  %v1614_v9 = vpack.c.bf16 %v65_v8, %v64_v7  ;;  %v66_v11 = vld [vmem:[#allocation5 + $0x30] sm:$0xff]  ;;  %1353 = vmatprep.mubr.f32.mxu0 %v54_v10  ;;  %v421_v14 = vld [vmem:[%s2150_s2 + $0x10] sm:$0xff]  ;;  %v420_v16 = vld [vmem:[%s2150_s2 + $0x8] sm:$0xff] }
  0x2a   :  { %1609 = vmatpush3.bf16.msra.mxu0 %v1606_v4  ;;  %v419_v13 = vld [vmem:[%s2150_s2] sm:$0xff]  ;;  %v1618_v15 = vpack.c.bf16 %v67_v12, %v66_v11  ;;  %432 = vperm.xlu1 %1856, %v421_v14   ;;  %v76_v17 = vld [vmem:[#allocation5 + $0x80] sm:$0xff]  ;;  %v77_v18 = vld [vmem:[#allocation5 + $0x88] sm:$0xff]  ;;  %v383_v4 = vlaneseq }
  0x2b   :  { %1611 = vmatprep.subr.bf16.mxu0 %v1610_v6  ;;  %426 = vperm.xlu0 %1855, %v419_v13   ;;  %v68_v19 = vld [vmem:[#allocation5 + $0x40] sm:$0xff]  ;;  %v69_v20 = vld [vmem:[#allocation5 + $0x48] sm:$0xff]  ;;  %v1638_v22 = vpack.c.bf16 %v77_v18, %v76_v17  ;;  %v78_v23 = vld [vmem:[#allocation5 + $0x90] sm:$0xff] }
  0x2c   :  { %v422_v21 = vld [vmem:[%s2150_s2 + $0x18] sm:$0xff]  ;;  %v79_v24 = vld [vmem:[#allocation5 + $0x98] sm:$0xff]  ;;  %v1622_v25 = vpack.c.bf16 %v69_v20, %v68_v19  ;;  %v423_v26 = vld [vmem:[%s2150_s2 + $0x20] sm:$0xff]  ;;  %v2056_v12 = vand.u32 127, %v383_v4 }
  0x2d   :  { %v80_v27 = vld [vmem:[#allocation5 + $0xa0] sm:$0xff]  ;;  %v81_v28 = vld [vmem:[#allocation5 + $0xa8] sm:$0xff]  ;;  %v70_v29 = vld [vmem:[#allocation5 + $0x50] sm:$0xff]  ;;  %1639 = vmatprep.subr.bf16.mxu1 %v1638_v22  ;;  %v1642_v32 = vpack.c.bf16 %v79_v24, %v78_v23  ;;  %v1934_v23 = vmov 0.0  }
  0x2e   :  { %1613 = vmatpush3.bf16.msra.mxu0 %v1610_v6  ;;  %435 = vperm.xlu1 %1856, %v422_v21   ;;  %v71_v30 = vld [vmem:[#allocation5 + $0x58] sm:$0xff]  ;;  %v1646_v33 = vpack.c.bf16 %v81_v28, %v80_v27  ;;  %v82_v35 = vld [vmem:[#allocation5 + $0xb0] sm:$0xff]  ;;  %v72_v37 = vld [vmem:[#allocation5 + $0x60] sm:$0xff]  ;;  %vm398_vm10 = vcmp.ge.s32.totalorder %v2056_v12, 64  ;;  %vm399_vm11 = vcmp.lt.s32.totalorder %v2056_v12, 96 }
  0x2f   :  { %1615 = vmatprep.subr.bf16.mxu0 %v1614_v9  ;;  %429 = vperm.xlu0 %1855, %v420_v16   ;;  %v424_v31 = vld [vmem:[%s2150_s2 + $0x28] sm:$0xff]  ;;  %v1626_v34 = vpack.c.bf16 %v71_v30, %v70_v29  ;;  %v73_v38 = vld [vmem:[#allocation5 + $0x68] sm:$0xff]  ;;  %v84_v41 = vld [vmem:[#allocation5 + $0xc0] sm:$0xff]  ;;  %s1134_s2 = sshll.u32 %s1935_s12, 4  ;;  %s1135_s2 = int_to_ptr.vmem [resolvable:$true] %s1134_s2 }
  0x30   :  { %1641 = vmatpush3.bf16.msra.mxu1 %v1638_v22  ;;  %v83_v36 = vld [vmem:[#allocation5 + $0xb8] sm:$0xff]  ;;  %v1630_v40 = vpack.c.bf16 %v73_v38, %v72_v37  ;;  %v85_v42 = vld [vmem:[#allocation5 + $0xc8] sm:$0xff]  ;;  %v74_v43 = vld [vmem:[#allocation5 + $0x70] sm:$0xff]  ;;  %s1901_s13 = scalar_lea.vmem %s1135_s2, 256  ;;  %p1906_p3 = scmp.lt.s32.totalorder %s1135_s2, %s1135_s2 }
  0x31   :  { %1643 = vmatprep.subr.bf16.mxu1 %v1642_v32  ;;  %v1650_v39 = vpack.c.bf16 %v83_v36, %v82_v35  ;;  %v75_v44 = vld [vmem:[#allocation5 + $0x78] sm:$0xff]  ;;  %v1654_v45 = vpack.c.bf16 %v85_v42, %v84_v41  ;;  %v86_v47 = vld [vmem:[#allocation5 + $0xd0] sm:$0xff]  ;;  %v88_v50 = vld [vmem:[#allocation5 + $0xe0] sm:$0xff]  ;;  %p1902_p2 = scmp.ne.s32.totalorder %s1135_s2, %s1901_s13  ;;  %p1907_p4 = scmp.lt.s32.totalorder %s1901_s13, %s1901_s13 }
  0x32   :  { %1617 = vmatpush3.bf16.msra.mxu0 %v1614_v9  ;;  %441 = vperm.xlu1 %1856, %v424_v31   ;;  %v1634_v46 = vpack.c.bf16 %v75_v44, %v74_v43  ;;  %v87_v48 = vld [vmem:[#allocation5 + $0xd8] sm:$0xff]  ;;  %v89_v51 = vld [vmem:[#allocation5 + $0xe8] sm:$0xff]  ;;  %v56_v54 = vld [vmem:[%s2149_s1 + $0x10] sm:$0xff] }
  0x33   :  { %1619 = vmatprep.subr.bf16.mxu0 %v1618_v15  ;;  %438 = vperm.xlu0 %1855, %v423_v26   ;;  %v1658_v49 = vpack.c.bf16 %v87_v48, %v86_v47  ;;  %v55_v52 = vld [vmem:[%s2149_s1 + $0x8] sm:$0xff]  ;;  %v1662_v53 = vpack.c.bf16 %v89_v51, %v88_v50  ;;  %v2031_v55 = vld [vmem:[%s2149_s1 + $0x18] sm:$0xff]  ;;  %v2036_v56 = vld [vmem:[%s2149_s1 + $0x20] sm:$0xff]  ;;  %p1908_p5 = por %p1907_p4, %p1906_p3 }
  0x34   :  { %1645 = vmatpush3.bf16.msra.mxu1 %v1642_v32  ;;  %v2043_v57 = vld [vmem:[%s2149_s1 + $0x28] sm:$0xff]  ;;  %v90_v58 = vld [vmem:[#allocation5 + $0xf0] sm:$0xff]  ;;  %v108_v38 = vld [vmem:[#allocation5 + $0x180] sm:$0xff] }
  0x35   :  { %1647 = vmatprep.subr.bf16.mxu1 %v1646_v33  ;;  %v91_v59 = vld [vmem:[#allocation5 + $0xf8] sm:$0xff]  ;;  %v2046_v61 = vld [vmem:[#allocation2] sm:$0xff]  ;;  %v112_v44 = vld [vmem:[#allocation5 + $0x1a0] sm:$0xff]  ;;  %p1909_p6 = pnand %p1908_p5, %p1902_p2 }
  0x36   :  { %1621 = vmatpush3.bf16.msra.mxu0 %v1618_v15  ;;  %v1666_v60 = vpack.c.bf16 %v91_v59, %v90_v58  ;;  %v2048_v62 = vld [vmem:[#allocation2 + $0x8] sm:$0xff]  ;;  %v1147_v0 = vld [vmem:[%s2153_s5] ss:$0 sm:$0xff]  ;;  %v116_v50 = vld [vmem:[#allocation5 + $0x1c0] sm:$0xff] }
  0x37   :  { %1623 = vmatprep.subr.bf16.mxu0 %v1622_v25  ;;  %v1670_v63 = vpack.c.bf16 %v2048_v62, %v2046_v61  ;;  %v2081_v36 = vld [vmem:[%s2151_s3] ss:$0 sm:$0xff]  ;;  %v111_v42 = vld [vmem:[#allocation5 + $0x198] sm:$0xff]  ;;  %v117_v51 = vld [vmem:[#allocation5 + $0x1c8] sm:$0xff] }
  0x38   :  { %1649 = vmatpush3.bf16.msra.mxu1 %v1646_v33  ;;  %v114_v47 = vld [vmem:[#allocation5 + $0x1b0] sm:$0xff]  ;;  %v115_v48 = vld [vmem:[#allocation5 + $0x1b8] sm:$0xff]  ;;  %v120_v59 = vld [vmem:[#allocation5 + $0x1e0] sm:$0xff] }
  0x39   :  { %1651 = vmatprep.subr.bf16.mxu1 %v1650_v39  ;;  %vm2094_vm12 = vmand %vm398_vm10, %vm399_vm11 }
  0x3a   :  { %1625 = vmatpush3.bf16.msra.mxu0 %v1622_v25 }
  0x3b   :  { %1627 = vmatprep.subr.bf16.mxu0 %v1626_v34 }
  0x3c   :  { %1653 = vmatpush3.bf16.msra.mxu1 %v1650_v39  ;;  %v109_v39 = vld [vmem:[#allocation5 + $0x188] sm:$0xff] }
  0x3d   :  { %1655 = vmatprep.subr.bf16.mxu1 %v1654_v45  ;;  %v1686_v41 = vpack.c.bf16 %v109_v39, %v108_v38 }
  0x3e   :  { %1629 = vmatpush3.bf16.msra.mxu0 %v1626_v34  ;;  %v384_v34 = vshrl.u32 %v383_v4, 7  ;;  %v93_v4 = vld [vmem:[#allocation5 + $0x108] sm:$0xff] }
  0x3f   :  { %1631 = vmatprep.subr.bf16.mxu0 %v1630_v40 }
  0x40   :  { %1657 = vmatpush3.bf16.msra.mxu1 %v1654_v45  ;;  %v2076_v35 = vadd.s32 8, %v384_v34  ;;  %vm630_vm7 = vcmp.eq.s32.totalorder %v384_v34, %v2081_v36  ;;  %v113_v45 = vld [vmem:[#allocation5 + $0x1a8] sm:$0xff] }
  0x41   :  { %1659 = vmatprep.subr.bf16.mxu1 %v1658_v49  ;;  %v1162_v37 = vsel %vm630_vm7, 1.0, %v1934_v23 }
  0x42   :  { %1633 = vmatpush3.bf16.msra.mxu0 %v1630_v40  ;;  %vm631_vm9 = vcmp.eq.s32.totalorder %v2076_v35, %v2081_v36  ;;  %v110_v40 = vld [vmem:[#allocation5 + $0x190] sm:$0xff]  ;;  %v133_v36 = vld [vmem:[#allocation5 + $0x248] sm:$0xff] }
  0x43   :  { %1635 = vmatprep.subr.bf16.mxu0 %v1634_v46  ;;  %v1690_v43 = vpack.c.bf16 %v111_v42, %v110_v40 }
  0x44   :  { %1661 = vmatpush3.bf16.msra.mxu1 %v1658_v49  ;;  %v1698_v49 = vpack.c.bf16 %v115_v48, %v114_v47 }
  0x45   :  { %1663 = vmatprep.subr.bf16.mxu1 %v1662_v53 }
  0x46   :  { %1637 = vmatpush3.bf16.msra.mxu0 %v1634_v46  ;;  %v1694_v46 = vpack.c.bf16 %v113_v45, %v112_v44 }
  0x47   :  { %1687 = vmatprep.subr.bf16.mxu0 %v1686_v41 }
  0x48   :  { %1665 = vmatpush3.bf16.msra.mxu1 %v1662_v53  ;;  %v118_v53 = vld [vmem:[#allocation5 + $0x1d0] sm:$0xff] }
  0x49   :  { %1354 = vmatmul.mubr.f32.vlgmr.msra.gmra.mrb[0].mxu0 %v55_v52  ;;  %1667 = vmatprep.subr.bf16.mxu1 %v1666_v60  ;;  %v1702_v52 = vpack.c.bf16 %v117_v51, %v116_v50 }
  0x4a   :  { %1356 = vmatprep.mubr.f32.mxu0 %v56_v54  ;;  %1689 = vmatpush3.bf16.msra.mxu0 %v1686_v41  ;;  %v119_v54 = vld [vmem:[#allocation5 + $0x1d8] sm:$0xff] }
  0x4b   :  { %1691 = vmatprep.subr.bf16.mxu0 %v1690_v43  ;;  %v1706_v58 = vpack.c.bf16 %v119_v54, %v118_v53 }
  0x4c   :  { %1669 = vmatpush3.bf16.msra.mxu1 %v1666_v60  ;;  %v121_v60 = vld [vmem:[#allocation5 + $0x1e8] sm:$0xff] }
  0x4d   :  { %1357 = vmatmul.mubr.f32.gmra.mrb[2].mxu0 %v2031_v55  ;;  %1671 = vmatprep.subr.bf16.mxu1 %v1670_v63 }
  0x4e   :  { %1359 = vmatprep.mubr.f32.mxu0 %v2036_v56  ;;  %1693 = vmatpush3.bf16.msra.mxu0 %v1690_v43 }
  0x4f   :  { %1695 = vmatprep.subr.bf16.mxu0 %v1694_v46 }
  0x51   :  { %1360 = vmatmul.mubr.f32.gmra.mrb[4].mxu0 %v2043_v57 }
  0x52   :  { %1463 = vmatprep.mubr.f32.mxu0 %v2046_v61  ;;  %1697 = vmatpush3.bf16.msra.mxu0 %v1694_v46 }
  0x53   :  { %1699 = vmatprep.subr.bf16.mxu0 %v1698_v49 }
  0x56   :  { %1701 = vmatpush3.bf16.msra.mxu0 %v1698_v49 }
  0x57   :  { %1703 = vmatprep.subr.bf16.mxu0 %v1702_v52 }
  0x5a   :  { %1705 = vmatpush3.bf16.msra.mxu0 %v1702_v52 }
  0x5b   :  { %1707 = vmatprep.subr.bf16.mxu0 %v1706_v58 }
  0x5e   :  { %1709 = vmatpush3.bf16.msra.mxu0 %v1706_v58 }
  0xa9   :  { %v433_v15 = vpop.permute.xlu1 %432 }
  0xaa   :  { %v427_v9 = vpop.permute.xlu0 %426  ;;  %vm445_vm2 = vcmp.eq.s32.totalorder %v433_v15, %v2056_v12 }
  0xab   :  { %vm443_vm0 = vcmp.eq.s32.totalorder %v427_v9, %v2056_v12  ;;  %v1151_v27 = vsel %vm445_vm2, 1.0, %v1934_v23  ;;  %v96_v9 = vld [vmem:[#allocation5 + $0x120] sm:$0xff] }
  0xac   :  { %v1149_v24 = vsel %vm443_vm0, 1.0, %v1934_v23 }
  0xad   :  { %v436_v26 = vpop.permute.xlu1 %435 }
  0xae   :  { %v430_v21 = vpop.permute.xlu0 %429  ;;  %vm446_vm4 = vcmp.eq.s32.totalorder %v436_v26, %v2056_v12  ;;  %v106_v26 = vld [vmem:[#allocation5 + $0x170] sm:$0xff] }
  0xaf   :  { %vm444_vm3 = vcmp.eq.s32.totalorder %v430_v21, %v2056_v12  ;;  %v1152_v31 = vsel %vm446_vm4, 1.0, %v1934_v23 }
  0xb0   :  { %v1150_v29 = vsel %vm444_vm3, 1.0, %v1934_v23 }
  0xb1   :  { %v442_v30 = vpop.permute.xlu1 %441 }
  0xb2   :  { %v439_v28 = vpop.permute.xlu0 %438  ;;  %vm448_vm6 = vcmp.eq.s32.totalorder %v442_v30, %v2056_v12 }
  0xb3   :  { %vm447_vm5 = vcmp.eq.s32.totalorder %v439_v28, %v2056_v12  ;;  %v1154_v33 = vsel %vm448_vm6, 1.0, %v1934_v23 }
  0xb4   :  { %v1153_v32 = vsel %vm447_vm5, 1.0, %v1934_v23 }
 0x11c   :  { %v1355_v1 = vpop.f32.mrb[0].mxu0 }
 0x11d   :  { %v255_v2 = vadd.f32 %v1355_v1, %v1147_v0  ;;  %v249_v3 = vpop.f32.mrb[1].mxu0  ;;  %v123_v1 = vld [vmem:[#allocation5 + $0x1f8] sm:$0xff] }
 0x11e   :  { %v250_v5 = vadd.f32 %v1147_v0, %v249_v3  ;;  %v92_v3 = vld [vmem:[#allocation5 + $0x100] sm:$0xff] }
 0x11f   :  { %v279_v8 = vmax.f32 %v255_v2, 0.0 }
 0x120   :  { %v1358_v6 = vpop.f32.mrb[2].mxu0  ;;  %v278_v7 = vmax.f32 %v250_v5, 0.0  ;;  %v1718_v5 = vpack.c.bf16 %v93_v4, %v92_v3 }
 0x121   :  { %v265_v10 = vadd.f32 %v1358_v6, %v1147_v0  ;;  %v259_v11 = vpop.f32.mrb[3].mxu0  ;;  %v94_v6 = vld [vmem:[#allocation5 + $0x110] sm:$0xff] }
 0x122   :  { %v260_v13 = vadd.f32 %v1147_v0, %v259_v11  ;;  %1394 = vmatprep.mubr.f32.mxu1 %v278_v7  ;;  %v95_v7 = vld [vmem:[#allocation5 + $0x118] sm:$0xff] }
 0x123   :  { %1395 = vmatmul.mubr.f32.vlgmr.msra.gmra.mrb[0].mxu1 %v279_v8  ;;  %v281_v17 = vmax.f32 %v265_v10, 0.0  ;;  %v1722_v8 = vpack.c.bf16 %v95_v7, %v94_v6  ;;  %v97_v10 = vld [vmem:[#allocation5 + $0x128] sm:$0xff]  ;;  %v126_v6 = vld [vmem:[#allocation5 + $0x210] sm:$0xff] }
 0x124   :  { %v280_v14 = vmax.f32 %v260_v13, 0.0  ;;  %v1361_v16 = vpop.f32.mrb[4].mxu0  ;;  %1673 = vmatpush3.bf16.msra.mxu1 %v1670_v63  ;;  %v1710_v63 = vpack.c.bf16 %v121_v60, %v120_v59  ;;  %v1726_v11 = vpack.c.bf16 %v97_v10, %v96_v9  ;;  %v98_v13 = vld [vmem:[#allocation5 + $0x130] sm:$0xff]  ;;  %v128_v10 = vld [vmem:[#allocation5 + $0x220] sm:$0xff] }
 0x125   :  { %v275_v18 = vadd.f32 %v1361_v16, %v1147_v0  ;;  %v269_v19 = vpop.f32.mrb[5].mxu0  ;;  %v100_v16 = vld [vmem:[#allocation5 + $0x140] sm:$0xff] }
 0x126   :  { %v270_v20 = vadd.f32 %v1147_v0, %v269_v19  ;;  %1397 = vmatprep.mubr.f32.mxu1 %v280_v14  ;;  %v122_v0 = vld [vmem:[#allocation5 + $0x1f0] sm:$0xff]  ;;  %1711 = vmatprep.subr.bf16.mxu0 %v1710_v63  ;;  %v99_v14 = vld [vmem:[#allocation5 + $0x138] sm:$0xff] }
 0x127   :  { %1398 = vmatmul.mubr.f32.gmra.mrb[2].mxu1 %v281_v17  ;;  %v283_v25 = vmax.f32 %v275_v18, 0.0  ;;  %v1714_v2 = vpack.c.bf16 %v123_v1, %v122_v0  ;;  %1713 = vmatpush3.bf16.msra.mxu0 %v1710_v63  ;;  %v1730_v15 = vpack.c.bf16 %v99_v14, %v98_v13  ;;  %v101_v17 = vld [vmem:[#allocation5 + $0x148] sm:$0xff]  ;;  %v102_v19 = vld [vmem:[#allocation5 + $0x150] sm:$0xff] }
 0x128   :  { %v282_v22 = vmax.f32 %v270_v20, 0.0  ;;  %v1734_v18 = vpack.c.bf16 %v101_v17, %v100_v16  ;;  %v103_v20 = vld [vmem:[#allocation5 + $0x158] sm:$0xff]  ;;  %v130_v14 = vld [vmem:[#allocation5 + $0x230] sm:$0xff] }
 0x129   :  { %1715 = vmatprep.subr.bf16.mxu0 %v1714_v2  ;;  %v1738_v21 = vpack.c.bf16 %v103_v20, %v102_v19  ;;  %v134_v17 = vld [vmem:[#allocation5 + $0x250] sm:$0xff]  ;;  %v136_v20 = vld [vmem:[#allocation5 + $0x260] sm:$0xff] }
 0x12a   :  { %1400 = vmatprep.mubr.f32.mxu1 %v282_v22  ;;  %v104_v22 = vld [vmem:[#allocation5 + $0x160] sm:$0xff] }
 0x12b   :  { %1401 = vmatmul.mubr.f32.gmra.mrb[4].mxu1 %v283_v25  ;;  %1717 = vmatpush3.bf16.msra.mxu0 %v1714_v2 }
 0x12c   :  { %1407 = vmatprep.mubr.msk.f32.mxu1 %vm461_vm1, %v1149_v24  ;;  %1719 = vmatprep.subr.bf16.mxu0 %v1718_v5  ;;  %v105_v24 = vld [vmem:[#allocation5 + $0x168] sm:$0xff] }
 0x12d   :  { %v1742_v25 = vpack.c.bf16 %v105_v24, %v104_v22 }
 0x12e   :  { %1464 = vmatmul.mubr.f32.vlgmr.msra.gmra.mrb[6].mxu0 %v2048_v62 }
 0x12f   :  { %1408 = vmatmul.mubr.msk.f32.vlgmr.msra.gmra.mrb[6].mxu1 %vm461_vm1, %v1150_v29  ;;  %1721 = vmatpush3.bf16.msra.mxu0 %v1718_v5  ;;  %v125_v5 = vld [vmem:[#allocation5 + $0x208] sm:$0xff] }
 0x130   :  { %1410 = vmatprep.mubr.msk.f32.mxu1 %vm461_vm1, %v1151_v27  ;;  %1723 = vmatprep.subr.bf16.mxu0 %v1722_v8  ;;  %v107_v27 = vld [vmem:[#allocation5 + $0x178] sm:$0xff] }
 0x131   :  { %v1746_v28 = vpack.c.bf16 %v107_v27, %v106_v26  ;;  %v138_v26 = vld [vmem:[#allocation5 + $0x270] sm:$0xff]  ;;  %v139_v27 = vld [vmem:[#allocation5 + $0x278] sm:$0xff] }
 0x133   :  { %1411 = vmatmul.mubr.msk.f32.gmra.mrb[8].mxu1 %vm461_vm1, %v1152_v31  ;;  %1725 = vmatpush3.bf16.msra.mxu0 %v1722_v8  ;;  %v127_v8 = vld [vmem:[#allocation5 + $0x218] sm:$0xff] }
 0x134   :  { %1413 = vmatprep.mubr.msk.f32.mxu1 %vm461_vm1, %v1153_v32  ;;  %1727 = vmatprep.subr.bf16.mxu0 %v1726_v11  ;;  %v1754_v9 = vpack.c.bf16 %v127_v8, %v126_v6 }
 0x137   :  { %1414 = vmatmul.mubr.msk.f32.gmra.mrb[10].mxu1 %vm461_vm1, %v1154_v33  ;;  %1729 = vmatpush3.bf16.msra.mxu0 %v1726_v11  ;;  %v1148_v33 = vld [vmem:[%s2153_s5 + $0x1] ss:$0 sm:$0xff]  ;;  %v129_v11 = vld [vmem:[#allocation5 + $0x228] sm:$0xff] }
 0x138   :  { %1428 = vmatprep.mubr.msk.f32.mxu1 %vm636_vm8, %v1162_v37  ;;  %1731 = vmatprep.subr.bf16.mxu0 %v1730_v15  ;;  %v1758_v13 = vpack.c.bf16 %v129_v11, %v128_v10  ;;  %v161_v10 = vld [vmem:[#allocation5 + $0x328] sm:$0xff] }
 0x13b   :  { %1733 = vmatpush3.bf16.msra.mxu0 %v1730_v15  ;;  %v131_v15 = vld [vmem:[#allocation5 + $0x238] sm:$0xff] }
 0x13c   :  { %1735 = vmatprep.subr.bf16.mxu0 %v1734_v18  ;;  %v1762_v35 = vpack.c.bf16 %v131_v15, %v130_v14  ;;  %v163_v14 = vld [vmem:[#allocation5 + $0x338] sm:$0xff]  ;;  %v164_v15 = vld [vmem:[#allocation5 + $0x340] sm:$0xff] }
 0x13f   :  { %1737 = vmatpush3.bf16.msra.mxu0 %v1734_v18  ;;  %v135_v18 = vld [vmem:[#allocation5 + $0x258] sm:$0xff] }
 0x140   :  { %1739 = vmatprep.subr.bf16.mxu0 %v1738_v21  ;;  %v1770_v19 = vpack.c.bf16 %v135_v18, %v134_v17  ;;  %v168_v18 = vld [vmem:[#allocation5 + $0x360] sm:$0xff] }
 0x143   :  { %1741 = vmatpush3.bf16.msra.mxu0 %v1738_v21  ;;  %v137_v21 = vld [vmem:[#allocation5 + $0x268] sm:$0xff] }
 0x144   :  { %1743 = vmatprep.subr.bf16.mxu0 %v1742_v25  ;;  %v1774_v22 = vpack.c.bf16 %v137_v21, %v136_v20  ;;  %v170_v21 = vld [vmem:[#allocation5 + $0x370] sm:$0xff] }
 0x147   :  { %1745 = vmatpush3.bf16.msra.mxu0 %v1742_v25 }
 0x148   :  { %1747 = vmatprep.subr.bf16.mxu0 %v1746_v28 }
 0x14b   :  { %1749 = vmatpush3.bf16.msra.mxu0 %v1746_v28  ;;  %v1778_v28 = vpack.c.bf16 %v139_v27, %v138_v26  ;;  %v1169_v27 = vld [vmem:[%s2153_s5 + $0x4] ss:$0 sm:$0xff] }
 0x1f6   :  { %v1396_v29 = vpop.f32.mrb[0].mxu1 }
 0x1f7   :  { %v354_v30 = vpop.f32.mrb[1].mxu1  ;;  %v360_v38 = vadd.f32 %v1396_v29, %v1148_v33  ;;  %v140_v29 = vld [vmem:[#allocation5 + $0x280] sm:$0xff] }
 0x1f8   :  { %v355_v39 = vadd.f32 %v1148_v33, %v354_v30  ;;  %v141_v30 = vld [vmem:[#allocation5 + $0x288] sm:$0xff] }
 0x1fa   :  { %v1399_v31 = vpop.f32.mrb[2].mxu1 }
 0x1fb   :  { %v364_v32 = vpop.f32.mrb[3].mxu1  ;;  %v1782_v31 = vpack.c.bf16 %v141_v30, %v140_v29 }
 0x1fc   :  { %v365_v44 = vadd.f32 %v1148_v33, %v364_v32  ;;  %v1166_v32 = vld [vmem:[%s2153_s5 + $0x2] ss:$0 sm:$0xff]  ;;  %v1168_v33 = vld [vmem:[%s2153_s5 + $0x6] ss:$0 sm:$0xff] }
 0x1fe   :  { %v1402_v34 = vpop.f32.mrb[4].mxu1 }
 0x1ff   :  { %v374_v37 = vpop.f32.mrb[5].mxu1 }
 0x202   :  { %v1409_v40 = vpop.f32.mrb[6].mxu1 }
 0x203   :  { %v614_v41 = vmul.f32 %v1409_v40, %v360_v38  ;;  %v546_v42 = vpop.f32.mrb[7].mxu1 }
 0x204   :  { %v613_v43 = vmul.f32 %v546_v42, %v355_v39  ;;  %v961_v39 = vmul.f32 %v1168_v33, %v2046_v61  ;;  %v143_v42 = vld [vmem:[#allocation5 + $0x298] sm:$0xff] }
 0x206   :  { %v1674_v45 = vpack.c.bf16 %v614_v41, %v613_v43  ;;  %v1412_v47 = vpop.f32.mrb[8].mxu1  ;;  %v142_v41 = vld [vmem:[#allocation5 + $0x290] sm:$0xff] }
 0x207   :  { %v604_v48 = vadd.f32 %v1412_v47, %v2031_v55  ;;  %v616_v49 = vmul.f32 0.0, %v1412_v47  ;;  %v556_v50 = vpop.f32.mrb[9].mxu1  ;;  %v144_v47 = vld [vmem:[#allocation5 + $0x2a0] sm:$0xff] }
 0x208   :  { %v615_v51 = vmul.f32 %v556_v50, %v365_v44  ;;  %1675 = vmatprep.subr.bf16.mxu1 %v1674_v45  ;;  %v146_v50 = vld [vmem:[#allocation5 + $0x2b0] sm:$0xff] }
 0x209   :  { %v610_v52 = vsel %vm2094_vm12, %v604_v48, 0.0  ;;  %1677 = vmatpush3.bf16.msra.mxu1 %v1674_v45  ;;  %v1786_v45 = vpack.c.bf16 %v143_v42, %v142_v41  ;;  %v145_v48 = vld [vmem:[#allocation5 + $0x2a8] sm:$0xff] }
 0x20a   :  { %v622_v53 = vadd.f32 %v616_v49, %v610_v52  ;;  %v1415_v12 = vpop.f32.mrb[10].mxu1  ;;  %v1790_v49 = vpack.c.bf16 %v145_v48, %v144_v47  ;;  %v148_v52 = vld [vmem:[#allocation5 + $0x2c0] sm:$0xff] }
 0x20b   :  { %v606_v54 = vadd.f32 %v1415_v12, %v2043_v57  ;;  %v618_v58 = vmul.f32 0.0, %v1415_v12  ;;  %v566_v59 = vpop.f32.mrb[11].mxu1  ;;  %v1163_v57 = vsel %vm631_vm9, 1.0, %v1934_v23  ;;  %v132_v23 = vld [vmem:[#allocation5 + $0x240] sm:$0xff] }
 0x20c   :  { %v1678_v60 = vpack.c.bf16 %v622_v53, %v615_v51  ;;  %v605_v63 = vadd.f32 %v566_v59, %v2036_v56  ;;  %v617_v0 = vmul.f32 0.0, %v566_v59  ;;  %v124_v56 = vld [vmem:[#allocation5 + $0x200] sm:$0xff]  ;;  %v1766_v16 = vpack.c.bf16 %v133_v36, %v132_v23  ;;  %v147_v51 = vld [vmem:[#allocation5 + $0x2b8] sm:$0xff]  ;;  %v149_v53 = vld [vmem:[#allocation5 + $0x2c8] sm:$0xff] }
 0x20d   :  { %v612_v55 = vsel %vm2094_vm12, %v606_v54, 0.0  ;;  %v1750_v7 = vpack.c.bf16 %v125_v5, %v124_v56  ;;  %v1794_v61 = vpack.c.bf16 %v147_v51, %v146_v50  ;;  %v1798_v12 = vpack.c.bf16 %v149_v53, %v148_v52  ;;  %v150_v54 = vld [vmem:[#allocation5 + $0x2d0] sm:$0xff]  ;;  %v157_v56 = vld [vmem:[#allocation5 + $0x308] sm:$0xff] }
 0x20e   :  { %v624_v1 = vadd.f32 %v618_v58, %v612_v55  ;;  %v611_v2 = vsel %vm2094_vm12, %v605_v63, 0.0  ;;  %1679 = vmatprep.subr.bf16.mxu1 %v1678_v60  ;;  %v151_v58 = vld [vmem:[#allocation5 + $0x2d8] sm:$0xff]  ;;  %v153_v63 = vld [vmem:[#allocation5 + $0x2e8] sm:$0xff]  ;;  %v154_v55 = vld [vmem:[#allocation5 + $0x2f0] sm:$0xff] }
 0x20f   :  { %v623_v3 = vadd.f32 %v617_v0, %v611_v2  ;;  %1681 = vmatpush3.bf16.msra.mxu1 %v1678_v60  ;;  %v1802_v59 = vpack.c.bf16 %v151_v58, %v150_v54  ;;  %v152_v60 = vld [vmem:[#allocation5 + $0x2e0] sm:$0xff]  ;;  %v158_v5 = vld [vmem:[#allocation5 + $0x310] sm:$0xff] }
 0x210   :  { %v1806_v0 = vpack.c.bf16 %v153_v63, %v152_v60  ;;  %v166_v36 = vld [vmem:[#allocation5 + $0x350] sm:$0xff] }
 0x211   :  { %v1682_v4 = vpack.c.bf16 %v624_v1, %v623_v3  ;;  %v155_v1 = vld [vmem:[#allocation5 + $0x2f8] sm:$0xff]  ;;  %v962_v3 = vmul.f32 %v1168_v33, %v2048_v62 }
 0x212   :  { %v1810_v2 = vpack.c.bf16 %v155_v1, %v154_v55 }
 0x213   :  { %1683 = vmatprep.subr.bf16.mxu1 %v1682_v4 }
 0x214   :  { %1685 = vmatpush3.bf16.msra.mxu1 %v1682_v4 }
 0x215   :  { %1751 = vmatprep.subr.bf16.mxu1 %v1750_v7 }
 0x217   :  { %1429 = vmatmul.mubr.msk.f32.vlgmr.msra.gmra.mrb[12].mxu1 %vm636_vm8, %v1163_v57  ;;  %v156_v57 = vld [vmem:[#allocation5 + $0x300] sm:$0xff] }
 0x218   :  { %1753 = vmatpush3.bf16.msra.mxu1 %v1750_v7  ;;  %v1814_v6 = vpack.c.bf16 %v157_v56, %v156_v57  ;;  %v159_v7 = vld [vmem:[#allocation5 + $0x318] sm:$0xff] }
 0x219   :  { %1755 = vmatprep.subr.bf16.mxu1 %v1754_v9  ;;  %v1818_v8 = vpack.c.bf16 %v159_v7, %v158_v5 }
 0x21a   :  { %1815 = vmatprep.subr.bf16.mxu0 %v1814_v6 }
 0x21c   :  { %1757 = vmatpush3.bf16.msra.mxu1 %v1754_v9  ;;  %v160_v9 = vld [vmem:[#allocation5 + $0x320] sm:$0xff] }
 0x21d   :  { %1759 = vmatprep.subr.bf16.mxu1 %v1758_v13  ;;  %v1822_v11 = vpack.c.bf16 %v161_v10, %v160_v9 }
 0x220   :  { %1761 = vmatpush3.bf16.msra.mxu1 %v1758_v13  ;;  %v162_v13 = vld [vmem:[#allocation5 + $0x330] sm:$0xff] }
 0x221   :  { %1763 = vmatprep.subr.bf16.mxu1 %v1762_v35  ;;  %v1826_v62 = vpack.c.bf16 %v163_v14, %v162_v13 }
 0x224   :  { %1765 = vmatpush3.bf16.msra.mxu1 %v1762_v35  ;;  %v165_v35 = vld [vmem:[#allocation5 + $0x348] sm:$0xff] }
 0x225   :  { %1767 = vmatprep.subr.bf16.mxu1 %v1766_v16  ;;  %v1830_v23 = vpack.c.bf16 %v165_v35, %v164_v15 }
 0x228   :  { %1769 = vmatpush3.bf16.msra.mxu1 %v1766_v16  ;;  %v167_v16 = vld [vmem:[#allocation5 + $0x358] sm:$0xff] }
 0x229   :  { %1771 = vmatprep.subr.bf16.mxu1 %v1770_v19  ;;  %v1834_v17 = vpack.c.bf16 %v167_v16, %v166_v36 }
 0x22c   :  { %1773 = vmatpush3.bf16.msra.mxu1 %v1770_v19  ;;  %v169_v19 = vld [vmem:[#allocation5 + $0x368] sm:$0xff] }
 0x22d   :  { %1775 = vmatprep.subr.bf16.mxu1 %v1774_v22  ;;  %v1838_v20 = vpack.c.bf16 %v169_v19, %v168_v18 }
 0x230   :  { %1777 = vmatpush3.bf16.msra.mxu1 %v1774_v22  ;;  %v171_v22 = vld [vmem:[#allocation5 + $0x378] sm:$0xff] }
 0x231   :  { %1779 = vmatprep.subr.bf16.mxu1 %v1778_v28 }
 0x234   :  { %1781 = vmatpush3.bf16.msra.mxu1 %v1778_v28 }
 0x235   :  { %1783 = vmatprep.subr.bf16.mxu1 %v1782_v31 }
 0x2ea   :  { %v2112_v24 = vpop.f32.mrb[12].mxu1 }
 0x2eb   :  { %v709_v25 = vpop.f32.mrb[13].mxu1  ;;  %v964_v4 = vadd.f32 %v2112_v24, %v962_v3 }
 0x2ec   :  { %1498 = vmatprep.mubr.f32.mxu0 %v709_v25  ;;  %v963_v46 = vadd.f32 %v961_v39, %v709_v25  ;;  %v1170_v39 = vld [vmem:[%s2153_s5 + $0x5] ss:$0 sm:$0xff] }
 0x2ed   :  { %1499 = vmatmul.mubr.f32.vlgmr.msra.gmra.mrb[6].mxu0 %v2112_v24  ;;  %v1842_v24 = vpack.c.bf16 %v171_v22, %v170_v21 }
 0x2ee   :  { %1817 = vmatpush3.bf16.msra.mxu0 %v1814_v6 }
 0x2ef   :  { %1819 = vmatprep.subr.bf16.mxu0 %v1818_v8 }
 0x2f2   :  { %1821 = vmatpush3.bf16.msra.mxu0 %v1818_v8 }
 0x2f3   :  { %1823 = vmatprep.subr.bf16.mxu0 %v1822_v11 }
 0x2f6   :  { %1825 = vmatpush3.bf16.msra.mxu0 %v1822_v11 }
 0x2f7   :  { %1827 = vmatprep.subr.bf16.mxu0 %v1826_v62 }
 0x2fa   :  { %1829 = vmatpush3.bf16.msra.mxu0 %v1826_v62 }
 0x2fb   :  { %1831 = vmatprep.subr.bf16.mxu0 %v1830_v23 }
 0x2fe   :  { %1833 = vmatpush3.bf16.msra.mxu0 %v1830_v23 }
 0x2ff   :  { %1835 = vmatprep.subr.bf16.mxu0 %v1834_v17 }
 0x302   :  { %1837 = vmatpush3.bf16.msra.mxu0 %v1834_v17 }
 0x303   :  { %1839 = vmatprep.subr.bf16.mxu0 %v1838_v20 }
 0x306   :  { %1841 = vmatpush3.bf16.msra.mxu0 %v1838_v20 }
 0x307   :  { %1843 = vmatprep.subr.bf16.mxu0 %v1842_v24 }
 0x30a   :  { %1845 = vmatpush3.bf16.msra.mxu0 %v1842_v24 }
 0x3c0   :  { %v1500_v34 = vpop.f32.mrb[6].mxu0 }
 0x3c1   :  { %v873_v37 = vadd.f32 %v1500_v34, %v1166_v32  ;;  %v859_v38 = vpop.f32.mrb[7].mxu0  ;;  %v1167_v34 = vld [vmem:[%s2153_s5 + $0x3] ss:$0 sm:$0xff] }
 0x3c2   :  { %v872_v40 = vadd.f32 %v1166_v32, %v859_v38 }
 0x3c3   :  { %v875_v44 = vmax.f32 %v873_v37, 0.0 }
 0x3c4   :  { %v874_v43 = vmax.f32 %v872_v40, 0.0 }
 0x3c6   :  { %1533 = vmatprep.mubr.f32.mxu1 %v874_v43 }
 0x3c7   :  { %1534 = vmatmul.mubr.f32.vlgmr.msra.gmra.mrb[14].mxu1 %v875_v44 }
 0x3c8   :  { %1785 = vmatpush3.bf16.msra.mxu1 %v1782_v31  ;;  %1568 = vmatprep.mubr.f32.mxu1 %v963_v46 }
 0x3c9   :  { %1787 = vmatprep.subr.bf16.mxu1 %v1786_v45 }
 0x3cc   :  { %1789 = vmatpush3.bf16.msra.mxu1 %v1786_v45 }
 0x3cd   :  { %1791 = vmatprep.subr.bf16.mxu1 %v1790_v49 }
 0x3d0   :  { %1793 = vmatpush3.bf16.msra.mxu1 %v1790_v49 }
 0x3d1   :  { %1795 = vmatprep.subr.bf16.mxu1 %v1794_v61 }
 0x3d4   :  { %1797 = vmatpush3.bf16.msra.mxu1 %v1794_v61 }
 0x3d5   :  { %1799 = vmatprep.subr.bf16.mxu1 %v1798_v12 }
 0x3d8   :  { %1801 = vmatpush3.bf16.msra.mxu1 %v1798_v12 }
 0x3d9   :  { %1803 = vmatprep.subr.bf16.mxu1 %v1802_v59 }
 0x3dc   :  { %1805 = vmatpush3.bf16.msra.mxu1 %v1802_v59 }
 0x3dd   :  { %1807 = vmatprep.subr.bf16.mxu1 %v1806_v0 }
 0x3e0   :  { %1809 = vmatpush3.bf16.msra.mxu1 %v1806_v0 }
 0x3e1   :  { %1811 = vmatprep.subr.bf16.mxu1 %v1810_v2 }
 0x3e4   :  { %1813 = vmatpush3.bf16.msra.mxu1 %v1810_v2 }
 0x3e7   :  { %1569 = vmatmul.mubr.f32.vlgmr.msra.gmra.mrb[16].mxu1 %v964_v4 }
 0x49a   :  { %v1535_v25 = vpop.f32.mrb[14].mxu1 }
 0x49b   :  { %v946_v26 = vpop.f32.mrb[15].mxu1  ;;  %v952_v37 = vadd.f32 %v1535_v25, %v1167_v34 }
 0x49c   :  { %v947_v38 = vadd.f32 %v1167_v34, %v946_v26 }
 0x49d   :  { %v956_v41 = vmax.f32 %v952_v37, 0.0 }
 0x49e   :  { %v955_v44 = vmax.f32 %v947_v38, 0.0 }
 0x4ba   :  { %v1570_v28 = vpop.f32.mrb[16].mxu1 }
 0x4bb   :  { %v1041_v29 = vadd.f32 %v1570_v28, %v1169_v27  ;;  %v1035_v30 = vpop.f32.mrb[17].mxu1 }
 0x4bc   :  { %v1036_v31 = vadd.f32 %v1169_v27, %v1035_v30 }
 0x4bd   :  { %v1045_v33 = vmax.f32 %v1041_v29, 0.0 }
 0x4be   :  { %v1044_v32 = vmax.f32 %v1036_v31, 0.0 }
 0x4c0   :  { %1603 = vmatprep.mubr.f32.mxu0 %v1044_v32 }
 0x4c1   :  { %1604 = vmatmul.mubr.f32.vlgmr.msra.gmra.mrb[8].mxu0 %v1045_v33 }
 0x594   :  { %v1605_v40 = vpop.f32.mrb[8].mxu0 }
 0x595   :  { %v1122_v42 = vadd.f32 %v1605_v40, %v1170_v39  ;;  %v1116_v43 = vpop.f32.mrb[9].mxu0 }
 0x596   :  { %v1117_v45 = vadd.f32 %v1170_v39, %v1116_v43 }
 0x597   :  { %v1126_v46 = vadd.f32 %v1122_v42, %v956_v41 }
 0x598   :  { %v1125_v47 = vadd.f32 %v1117_v45, %v955_v44 }
 0x599   :  { %1128 = vst [vmem:[#allocation7 + $0x8] sm:$0xff] %v1126_v46 }
 0x59a   :  { %1127 = vst [vmem:[#allocation7] sm:$0xff] %v1125_v47 }
 0x59b   :  { %1912 = shalt.err (!%p1909_p6)
}
 0x59c   :  { %s1913_s15 = scalar_lea.hbm %s2154_s6, 256 }
 0x59d   :  { %p1914_p7 = scmp.ne.s32.totalorder %s2154_s6, %s1913_s15  ;;  %p1917_p8 = scmp.lt.u32.totalorder %s1913_s15, %s2154_s6 }
 0x59f   :  { %p1919_p9 = pnand %p1917_p8, %p1914_p7 }
 0x5a1   :  { %1922 = shalt.err (!%p1919_p9)
}
 0x5a2   :  { %1140 = dma.vmem_to_hbm [thread:$0]  %s1135_s2, 256, %s2154_s6, [#allocation4], %s1930_s7, %s1930_s7, %s1931_s8  }
 0x5a3   :  { %1927 = dma.done.wait [#allocation4], 256  }
 0x5a4   :  { %1928 = vsyncadd [#allocation4], 4294967040 }
 0x5a5   :  { %1144 = vsyncpa [#allocation3], 1 }
 0x5a6   :  { %1145 = vsyncpa [#allocation6], 1 }
 0x5a7   :  { %1146 = vsyncpa [#allocation4], 1 }

</bundles_post_ra>
